<compile_context>
chip_gen: v5e
topology: v5e:2x2
jax: 0.10.0
libtpu: 0.0.40
codegen_flags: <defaults>
</compile_context>

<pallas_src>
import math
from functools import partial

import jax
import jax.numpy as jnp
from jax import lax
from jax.experimental import pallas as pl
from jax.experimental.pallas import tpu as pltpu

_LANE = 128
_TARGET_BLOCK_BYTES = 4 * 1024 * 1024           # ~4 MiB activation blocks
_MAX_RESIDENT_TABLE_BYTES = 20 * 1024 * 1024    # emb table (x2 buffers) must fit VMEM


# ---------------------------------------------------------------------------
# Sinusoidal PE table (matches the PyTorch buffer, sans the singleton dim).
# ---------------------------------------------------------------------------
def make_pe_table(d_model: int, max_len: int = 500, dtype=jnp.float32):
    position = jnp.arange(max_len, dtype=jnp.float32)[:, None]           # [L, 1]
    div_term = jnp.exp(jnp.arange(0, d_model, 2, dtype=jnp.float32)
                       * (-math.log(10000.0) / d_model))                 # [E/2]
    pe = jnp.zeros((max_len, d_model), dtype=jnp.float32)
    pe = pe.at[:, 0::2].set(jnp.sin(position * div_term))
    pe = pe.at[:, 1::2].set(jnp.cos(position * div_term))
    return pe.astype(dtype)


# ---------------------------------------------------------------------------
# Standalone PE add:  out[b, t, e] = x[b, t, e] + pe[t, e]
# ---------------------------------------------------------------------------
def _choose_fold(T: int, E: int) -> int:
    """Pick G | T for the (B, G, (T//G)*E) view: fill the 8 sublanes while
    keeping the lane dim a multiple of 128 when possible (lane-dense stores)."""
    divisors = [d for d in range(1, T + 1) if T % d == 0]

    def score(g):
        lane = (T // g) * E
        return (
            (lane % _LANE) == 0,            # lane-dense first
            min(g, 8) / 8.0,                # fill the 8 sublanes
            g / (pl.cdiv(g, 8) * 8),        # minimize sublane padding for g > 8
            -g,                             # tie-break: smaller g => wider lanes
        )

    return max(divisors, key=score)


def _choose_tiles(B: int, G: int, C: int, itemsize: int):
    """(tB, tC) for the (B, G, C) view; tC always divides C (no ragged tail)."""
    row_bytes = G * C * itemsize            # one batch element's slab
    tC = C
    if row_bytes > _TARGET_BLOCK_BYTES and C % _LANE == 0:
        nl = C // _LANE
        best = 1
        for m in range(1, nl + 1):
            if nl % m == 0 and m * G * _LANE * itemsize <= _TARGET_BLOCK_BYTES:
                best = m
        tC = best * _LANE
    blk_row = G * tC * itemsize
    tB = max(1, min(B, _TARGET_BLOCK_BYTES // blk_row))

    def nblocks(tb, tc):
        return pl.cdiv(B, tb) * pl.cdiv(C, tc)

    # >= 2 blocks (v7x has 2 TensorCores), ideally 4-8 when blocks stay >= 1 MiB.
    if nblocks(tB, tC) < 4 and B >= 4 and pl.cdiv(B, 4) * blk_row >= (1 << 20):
        tB = pl.cdiv(B, 4)
    if nblocks(tB, tC) < 2 and B >= 2:
        tB = pl.cdiv(B, 2)
    if nblocks(tB, tC) < 2 and tC == C and C % (2 * _LANE) == 0:
        tC = C // 2                          # B == 1: fall back to halving lanes
    return tB, tC


def _pe_add_kernel(x_ref, pe_ref, o_ref, *, n_col_blocks):
    # x_ref / o_ref: (tB, G, tC);  pe_ref: (G, C) resident in VMEM.
    if n_col_blocks == 1:
        o_ref[...] = x_ref[...] + pe_ref[...]
    else:
        tC = x_ref.shape[-1]
        c0 = pl.multiple_of(pl.program_id(1) * tC, _LANE)
        o_ref[...] = x_ref[...] + pe_ref[:, pl.ds(c0, tC)]


def positional_encoding(x: jax.Array, pe_table: jax.Array) -> jax.Array:
    """x: [B, T, E]; pe_table: [max_len, E].  Returns x + pe[:T] (broadcast on B).

    Note: the pallas_call aliases x's buffer with the output
    (input_output_aliases={0: 0}); under jit with a donated x the original
    buffer is clobbered, so consumers of x must read it before this call.
    """
    B, T, E = x.shape
    assert T <= pe_table.shape[0], "sequence longer than positional-encoding table"
    itemsize = jnp.dtype(x.dtype).itemsize

    G = _choose_fold(T, E)
    C = (T // G) * E
    x3 = x.reshape(B, G, C)
    pe2 = pe_table[:T].astype(x.dtype).reshape(G, C)

    tB, tC = _choose_tiles(B, G, C, itemsize)
    grid = (pl.cdiv(B, tB), C // tC)

    # double-buffered x/out blocks + resident pe slab, plus headroom
    vmem_bytes = (4 * tB * G * tC + 2 * G * C) * itemsize
    vmem_limit = int(min(48 << 20, max(16 << 20, 2 * vmem_bytes + (2 << 20))))

    out3 = pl.pallas_call(
        partial(_pe_add_kernel, n_col_blocks=grid[1]),
        out_shape=jax.ShapeDtypeStruct((B, G, C), x.dtype),
        grid_spec=pltpu.PrefetchScalarGridSpec(
            num_scalar_prefetch=0,
            grid=grid,
            in_specs=[
                pl.BlockSpec((tB, G, tC), lambda i, j: (i, 0, j)),   # x
                pl.BlockSpec((G, C), lambda i, j: (0, 0)),           # pe (resident)
            ],
            out_specs=pl.BlockSpec((tB, G, tC), lambda i, j: (i, 0, j)),
        ),
        compiler_params=pltpu.CompilerParams(
            dimension_semantics=("parallel", "parallel"),
            vmem_limit_bytes=vmem_limit),
        input_output_aliases={0: 0},
        cost_estimate=pl.CostEstimate(
            flops=B * T * E, transcendentals=0,
            bytes_accessed=(2 * B * T * E + T * E) * itemsize),
    )(x3, pe2)
    return out3.reshape(B, T, E)


# ---------------------------------------------------------------------------
# Fused embedding lookup + PE add (the review's highest-value change):
#   out[b, t, :] = emb_table[tokens[b, t], :] + pe_table[t, :]
# ---------------------------------------------------------------------------
def _choose_seq_tile(T: int) -> int:
    if T <= 512:
        return T                             # full T is always a legal block dim
    for tt in range(512, 7, -1):
        if tt % 8 == 0 and T % tt == 0:
            return tt
    return T


def language_model_embed(tokens: jax.Array, emb_table: jax.Array,
                         pe_table: jax.Array) -> jax.Array:
    """Fused `audio_embedding` + `position_encode` (inference; dropout = identity)."""
    B, T = tokens.shape
    V, E = emb_table.shape
    dtype = emb_table.dtype
    itemsize = jnp.dtype(dtype).itemsize
    assert T <= pe_table.shape[0], "sequence longer than positional-encoding table"

    if 2 * V * E * itemsize > _MAX_RESIDENT_TABLE_BYTES:
        # TODO(synk): large-vocab path — stream the table / DMA-gather rows.
        x = jnp.take(emb_table, tokens, axis=0)
        return positional_encoding(x, pe_table)

    tT = _choose_seq_tile(T)
    grid = (B, T // tT)
    pe_t = pe_table[:T].astype(dtype)
    tok_flat = tokens.reshape(B * T).astype(jnp.int32)

    def kernel(tok_ref, emb_ref, pe_ref, o_ref):
        # tok_ref: SMEM (B*T,) ids;  emb_ref: (V, E) resident table;
        # pe_ref: (tT, E) PE rows for this tile;  o_ref: (1, tT, E).
        b = pl.program_id(0)
        j = pl.program_id(1)
        base = b * T + j * tT

        def body(i, carry):
            tok = tok_ref[base + i]
            o_ref[0, pl.ds(i, 1), :] = (emb_ref[pl.ds(tok, 1), :]
                                        + pe_ref[pl.ds(i, 1), :])
            return carry

        lax.fori_loop(0, tT, body, 0, unroll=(tT <= 16))

    vmem_bytes = (2 * V * E + 4 * tT * E) * itemsize
    vmem_limit = int(min(48 << 20, max(16 << 20, 2 * vmem_bytes + (2 << 20))))

    return pl.pallas_call(
        kernel,
        out_shape=jax.ShapeDtypeStruct((B, T, E), dtype),
        grid_spec=pltpu.PrefetchScalarGridSpec(
            num_scalar_prefetch=1,
            grid=grid,
            in_specs=[
                pl.BlockSpec((V, E), lambda b, j, tok: (0, 0)),     # table, resident
                pl.BlockSpec((tT, E), lambda b, j, tok: (j, 0)),    # pe rows
            ],
            out_specs=pl.BlockSpec((1, tT, E), lambda b, j, tok: (b, j, 0)),
        ),
        compiler_params=pltpu.CompilerParams(
            dimension_semantics=("parallel", "parallel"),
            vmem_limit_bytes=vmem_limit),
        cost_estimate=pl.CostEstimate(
            flops=B * T * E, transcendentals=0,
            bytes_accessed=(V * E + T * E + B * T * E) * itemsize + B * T * 4),
    )(tok_flat, emb_table, pe_t)


if __name__ == "__main__":
    B, T, V, E = 2, 8, 64, 32
    key = jax.random.PRNGKey(0)
    k1, k2, k3 = jax.random.split(key, 3)

    tokens = jax.random.randint(k1, (B, T), 0, V, dtype=jnp.int32)
    emb_table = jax.random.normal(k2, (V, E), dtype=jnp.float32)
    pe_table = make_pe_table(d_model=E, max_len=500, dtype=jnp.float32)

    # References computed before the kernels run (the standalone PE kernel
    # aliases its input buffer).
    pe_t = pe_table[:T][None, :, :]
    ref_embed = emb_table[tokens] + pe_t

    # Fused embedding + positional encoding (primary path).
    out = jax.block_until_ready(language_model_embed(tokens, emb_table, pe_table))
    assert out.shape == (B, T, E)
    assert jnp.allclose(out, ref_embed, atol=1e-6, rtol=1e-6), "fused embed+PE mismatch"

    # Standalone PE add (fallback path, f32).
    x = jax.random.normal(k3, (B, T, E), dtype=jnp.float32)
    ref_pe = x + pe_t
    out2 = jax.block_until_ready(positional_encoding(x, pe_table))
    assert out2.shape == (B, T, E)
    assert jnp.allclose(out2, ref_pe, atol=1e-6, rtol=1e-6), "f32 PE-add mismatch"

    # bf16 path (kernel is HBM-bandwidth bound, bf16 halves the bytes).
    x_bf16 = x.astype(jnp.bfloat16)
    ref_bf16 = x_bf16 + pe_table[:T].astype(jnp.bfloat16)[None, :, :]
    out_bf16 = jax.block_until_ready(positional_encoding(x_bf16, pe_table))
    assert out_bf16.dtype == jnp.bfloat16
    assert jnp.allclose(out_bf16.astype(jnp.float32),
                        ref_bf16.astype(jnp.float32), atol=2e-2), "bf16 PE-add mismatch"

    print("KERNEL_OK")
</pallas_src>

<mosaic_0001>
module attributes {stable_mosaic.version = 11 : i64} {
  func.func @kernel(%arg0: i32, %arg1: i32, %arg2: memref<16xi32, #tpu.memory_space<smem>>, %arg3: memref<64x32xf32, #tpu.memory_space<vmem>>, %arg4: memref<8x32xf32, #tpu.memory_space<vmem>>, %arg5: memref<1x8x32xf32, #tpu.memory_space<vmem>>) attributes {dimension_semantics = [#tpu.dimension_semantics<parallel>, #tpu.dimension_semantics<parallel>], iteration_bounds = array<i64: 2, 1>, scalar_prefetch = 1 : i64, scratch_operands = 0 : i64, tpu.core_type = #tpu.core_type<tc>, window_params = [{pipeline_mode = #tpu.pipeline_mode<synchronous>, transform_indices = @transform_0, window_bounds = array<i64: 64, 32>}, {transform_indices = @transform_1, window_bounds = array<i64: 8, 32>}, {transform_indices = @transform_2, window_bounds = array<i64: 1, 8, 32>}]} {
    %c8_i32 = arith.constant 8 : i32
    %0 = arith.muli %arg0, %c8_i32 : i32
    %c8_i32_0 = arith.constant 8 : i32
    %1 = arith.muli %arg1, %c8_i32_0 : i32
    %2 = arith.addi %0, %1 : i32
    %c0_i32 = arith.constant 0 : i32
    %3 = arith.addi %2, %c0_i32 : i32
    %4 = arith.index_cast %3 : i32 to index
    %5 = memref.load %arg2[%4] : memref<16xi32, #tpu.memory_space<smem>>
    %6 = arith.index_cast %5 : i32 to index
    %c0 = arith.constant 0 : index
    %7 = vector.load %arg3[%6, %c0] : memref<64x32xf32, #tpu.memory_space<vmem>>, vector<1x32xf32>
    %8 = arith.index_cast %c0_i32 : i32 to index
    %c0_1 = arith.constant 0 : index
    %9 = vector.load %arg4[%8, %c0_1] : memref<8x32xf32, #tpu.memory_space<vmem>>, vector<1x32xf32>
    %10 = arith.addf %7, %9 : vector<1x32xf32>
    %c0_2 = arith.constant 0 : index
    %11 = arith.index_cast %c0_i32 : i32 to index
    %c0_3 = arith.constant 0 : index
    %12 = vector.load %arg5[%c0_2, %11, %c0_3] : memref<1x8x32xf32, #tpu.memory_space<vmem>>, vector<1x1x32xf32>
    %13 = vector.shape_cast %12 : vector<1x1x32xf32> to vector<1x32xf32>
    %14 = vector.shape_cast %10 : vector<1x32xf32> to vector<1x1x32xf32>
    tpu.vector_store %arg5[%c0_2, %11, %c0_3], %14 {strides = array<i32>} : memref<1x8x32xf32, #tpu.memory_space<vmem>>, vector<1x1x32xf32>,
    %c1_i32 = arith.constant 1 : i32
    %15 = arith.addi %2, %c1_i32 : i32
    %16 = arith.index_cast %15 : i32 to index
    %17 = memref.load %arg2[%16] : memref<16xi32, #tpu.memory_space<smem>>
    %18 = arith.index_cast %17 : i32 to index
    %c0_4 = arith.constant 0 : index
    %19 = vector.load %arg3[%18, %c0_4] : memref<64x32xf32, #tpu.memory_space<vmem>>, vector<1x32xf32>
    %20 = arith.index_cast %c1_i32 : i32 to index
    %c0_5 = arith.constant 0 : index
    %21 = vector.load %arg4[%20, %c0_5] : memref<8x32xf32, #tpu.memory_space<vmem>>, vector<1x32xf32>
    %22 = arith.addf %19, %21 : vector<1x32xf32>
    %c0_6 = arith.constant 0 : index
    %23 = arith.index_cast %c1_i32 : i32 to index
    %c0_7 = arith.constant 0 : index
    %24 = vector.load %arg5[%c0_6, %23, %c0_7] : memref<1x8x32xf32, #tpu.memory_space<vmem>>, vector<1x1x32xf32>
    %25 = vector.shape_cast %24 : vector<1x1x32xf32> to vector<1x32xf32>
    %26 = vector.shape_cast %22 : vector<1x32xf32> to vector<1x1x32xf32>
    tpu.vector_store %arg5[%c0_6, %23, %c0_7], %26 {strides = array<i32>} : memref<1x8x32xf32, #tpu.memory_space<vmem>>, vector<1x1x32xf32>,
    %c2_i32 = arith.constant 2 : i32
    %27 = arith.addi %2, %c2_i32 : i32
    %28 = arith.index_cast %27 : i32 to index
    %29 = memref.load %arg2[%28] : memref<16xi32, #tpu.memory_space<smem>>
    %30 = arith.index_cast %29 : i32 to index
    %c0_8 = arith.constant 0 : index
    %31 = vector.load %arg3[%30, %c0_8] : memref<64x32xf32, #tpu.memory_space<vmem>>, vector<1x32xf32>
    %32 = arith.index_cast %c2_i32 : i32 to index
    %c0_9 = arith.constant 0 : index
    %33 = vector.load %arg4[%32, %c0_9] : memref<8x32xf32, #tpu.memory_space<vmem>>, vector<1x32xf32>
    %34 = arith.addf %31, %33 : vector<1x32xf32>
    %c0_10 = arith.constant 0 : index
    %35 = arith.index_cast %c2_i32 : i32 to index
    %c0_11 = arith.constant 0 : index
    %36 = vector.load %arg5[%c0_10, %35, %c0_11] : memref<1x8x32xf32, #tpu.memory_space<vmem>>, vector<1x1x32xf32>
    %37 = vector.shape_cast %36 : vector<1x1x32xf32> to vector<1x32xf32>
    %38 = vector.shape_cast %34 : vector<1x32xf32> to vector<1x1x32xf32>
    tpu.vector_store %arg5[%c0_10, %35, %c0_11], %38 {strides = array<i32>} : memref<1x8x32xf32, #tpu.memory_space<vmem>>, vector<1x1x32xf32>,
    %c3_i32 = arith.constant 3 : i32
    %39 = arith.addi %2, %c3_i32 : i32
    %40 = arith.index_cast %39 : i32 to index
    %41 = memref.load %arg2[%40] : memref<16xi32, #tpu.memory_space<smem>>
    %42 = arith.index_cast %41 : i32 to index
    %c0_12 = arith.constant 0 : index
    %43 = vector.load %arg3[%42, %c0_12] : memref<64x32xf32, #tpu.memory_space<vmem>>, vector<1x32xf32>
    %44 = arith.index_cast %c3_i32 : i32 to index
    %c0_13 = arith.constant 0 : index
    %45 = vector.load %arg4[%44, %c0_13] : memref<8x32xf32, #tpu.memory_space<vmem>>, vector<1x32xf32>
    %46 = arith.addf %43, %45 : vector<1x32xf32>
    %c0_14 = arith.constant 0 : index
    %47 = arith.index_cast %c3_i32 : i32 to index
    %c0_15 = arith.constant 0 : index
    %48 = vector.load %arg5[%c0_14, %47, %c0_15] : memref<1x8x32xf32, #tpu.memory_space<vmem>>, vector<1x1x32xf32>
    %49 = vector.shape_cast %48 : vector<1x1x32xf32> to vector<1x32xf32>
    %50 = vector.shape_cast %46 : vector<1x32xf32> to vector<1x1x32xf32>
    tpu.vector_store %arg5[%c0_14, %47, %c0_15], %50 {strides = array<i32>} : memref<1x8x32xf32, #tpu.memory_space<vmem>>, vector<1x1x32xf32>,
    %c4_i32 = arith.constant 4 : i32
    %51 = arith.addi %2, %c4_i32 : i32
    %52 = arith.index_cast %51 : i32 to index
    %53 = memref.load %arg2[%52] : memref<16xi32, #tpu.memory_space<smem>>
    %54 = arith.index_cast %53 : i32 to index
    %c0_16 = arith.constant 0 : index
    %55 = vector.load %arg3[%54, %c0_16] : memref<64x32xf32, #tpu.memory_space<vmem>>, vector<1x32xf32>
    %56 = arith.index_cast %c4_i32 : i32 to index
    %c0_17 = arith.constant 0 : index
    %57 = vector.load %arg4[%56, %c0_17] : memref<8x32xf32, #tpu.memory_space<vmem>>, vector<1x32xf32>
    %58 = arith.addf %55, %57 : vector<1x32xf32>
    %c0_18 = arith.constant 0 : index
    %59 = arith.index_cast %c4_i32 : i32 to index
    %c0_19 = arith.constant 0 : index
    %60 = vector.load %arg5[%c0_18, %59, %c0_19] : memref<1x8x32xf32, #tpu.memory_space<vmem>>, vector<1x1x32xf32>
    %61 = vector.shape_cast %60 : vector<1x1x32xf32> to vector<1x32xf32>
    %62 = vector.shape_cast %58 : vector<1x32xf32> to vector<1x1x32xf32>
    tpu.vector_store %arg5[%c0_18, %59, %c0_19], %62 {strides = array<i32>} : memref<1x8x32xf32, #tpu.memory_space<vmem>>, vector<1x1x32xf32>,
    %c5_i32 = arith.constant 5 : i32
    %63 = arith.addi %2, %c5_i32 : i32
    %64 = arith.index_cast %63 : i32 to index
    %65 = memref.load %arg2[%64] : memref<16xi32, #tpu.memory_space<smem>>
    %66 = arith.index_cast %65 : i32 to index
    %c0_20 = arith.constant 0 : index
    %67 = vector.load %arg3[%66, %c0_20] : memref<64x32xf32, #tpu.memory_space<vmem>>, vector<1x32xf32>
    %68 = arith.index_cast %c5_i32 : i32 to index
    %c0_21 = arith.constant 0 : index
    %69 = vector.load %arg4[%68, %c0_21] : memref<8x32xf32, #tpu.memory_space<vmem>>, vector<1x32xf32>
    %70 = arith.addf %67, %69 : vector<1x32xf32>
    %c0_22 = arith.constant 0 : index
    %71 = arith.index_cast %c5_i32 : i32 to index
    %c0_23 = arith.constant 0 : index
    %72 = vector.load %arg5[%c0_22, %71, %c0_23] : memref<1x8x32xf32, #tpu.memory_space<vmem>>, vector<1x1x32xf32>
    %73 = vector.shape_cast %72 : vector<1x1x32xf32> to vector<1x32xf32>
    %74 = vector.shape_cast %70 : vector<1x32xf32> to vector<1x1x32xf32>
    tpu.vector_store %arg5[%c0_22, %71, %c0_23], %74 {strides = array<i32>} : memref<1x8x32xf32, #tpu.memory_space<vmem>>, vector<1x1x32xf32>,
    %c6_i32 = arith.constant 6 : i32
    %75 = arith.addi %2, %c6_i32 : i32
    %76 = arith.index_cast %75 : i32 to index
    %77 = memref.load %arg2[%76] : memref<16xi32, #tpu.memory_space<smem>>
    %78 = arith.index_cast %77 : i32 to index
    %c0_24 = arith.constant 0 : index
    %79 = vector.load %arg3[%78, %c0_24] : memref<64x32xf32, #tpu.memory_space<vmem>>, vector<1x32xf32>
    %80 = arith.index_cast %c6_i32 : i32 to index
    %c0_25 = arith.constant 0 : index
    %81 = vector.load %arg4[%80, %c0_25] : memref<8x32xf32, #tpu.memory_space<vmem>>, vector<1x32xf32>
    %82 = arith.addf %79, %81 : vector<1x32xf32>
    %c0_26 = arith.constant 0 : index
    %83 = arith.index_cast %c6_i32 : i32 to index
    %c0_27 = arith.constant 0 : index
    %84 = vector.load %arg5[%c0_26, %83, %c0_27] : memref<1x8x32xf32, #tpu.memory_space<vmem>>, vector<1x1x32xf32>
    %85 = vector.shape_cast %84 : vector<1x1x32xf32> to vector<1x32xf32>
    %86 = vector.shape_cast %82 : vector<1x32xf32> to vector<1x1x32xf32>
    tpu.vector_store %arg5[%c0_26, %83, %c0_27], %86 {strides = array<i32>} : memref<1x8x32xf32, #tpu.memory_space<vmem>>, vector<1x1x32xf32>,
    %c7_i32 = arith.constant 7 : i32
    %87 = arith.addi %2, %c7_i32 : i32
    %88 = arith.index_cast %87 : i32 to index
    %89 = memref.load %arg2[%88] : memref<16xi32, #tpu.memory_space<smem>>
    %90 = arith.index_cast %89 : i32 to index
    %c0_28 = arith.constant 0 : index
    %91 = vector.load %arg3[%90, %c0_28] : memref<64x32xf32, #tpu.memory_space<vmem>>, vector<1x32xf32>
    %92 = arith.index_cast %c7_i32 : i32 to index
    %c0_29 = arith.constant 0 : index
    %93 = vector.load %arg4[%92, %c0_29] : memref<8x32xf32, #tpu.memory_space<vmem>>, vector<1x32xf32>
    %94 = arith.addf %91, %93 : vector<1x32xf32>
    %c0_30 = arith.constant 0 : index
    %95 = arith.index_cast %c7_i32 : i32 to index
    %c0_31 = arith.constant 0 : index
    %96 = vector.load %arg5[%c0_30, %95, %c0_31] : memref<1x8x32xf32, #tpu.memory_space<vmem>>, vector<1x1x32xf32>
    %97 = vector.shape_cast %96 : vector<1x1x32xf32> to vector<1x32xf32>
    %98 = vector.shape_cast %94 : vector<1x32xf32> to vector<1x1x32xf32>
    tpu.vector_store %arg5[%c0_30, %95, %c0_31], %98 {strides = array<i32>} : memref<1x8x32xf32, #tpu.memory_space<vmem>>, vector<1x1x32xf32>,
    %c8_i32_32 = arith.constant 8 : i32
    return
  }
  func.func @transform_0(%arg0: i32, %arg1: i32, %arg2: memref<16xi32, #tpu.memory_space<smem>>) -> (i32, i32) {
    %c0_i32 = arith.constant 0 : i32
    %c0_i32_0 = arith.constant 0 : i32
    %c0_i32_1 = arith.constant 0 : i32
    return %c0_i32, %c0_i32_0 : i32, i32
  }
  func.func @transform_1(%arg0: i32, %arg1: i32, %arg2: memref<16xi32, #tpu.memory_space<smem>>) -> (i32, i32) {
    %c0_i32 = arith.constant 0 : i32
    %c0_i32_0 = arith.constant 0 : i32
    return %arg1, %c0_i32 : i32, i32
  }
  func.func @transform_2(%arg0: i32, %arg1: i32, %arg2: memref<16xi32, #tpu.memory_space<smem>>) -> (i32, i32, i32) {
    %c0_i32 = arith.constant 0 : i32
    %c0_i32_0 = arith.constant 0 : i32
    return %arg0, %arg1, %c0_i32 : i32, i32, i32
  }
}

</mosaic_0001>

<bundles_post_ra>
// kernel: tpu_custom_call.1
= control target key start
LH: loop header
LB: loop body
LE: loop exit
PB: predicated region body
PF: predicated region fallthrough
CT: control target
= control target key end

     0   :  { %s478_s15 = smov [#allocation3]   ;;  %s688_s0 = inlined_call_operand.vmem [shape: s32[16], index: 0, kind: input, shape index: {}]   ;;  %s689_s1 = inlined_call_operand.vmem [shape: f32[64,32], index: 1, kind: input, shape index: {}]   ;;  %s690_s2 = inlined_call_operand.vmem [shape: f32[8,32], index: 2, kind: input, shape index: {}]   ;;  %s691_s3 = inlined_call_operand.hbm [shape: f32[2,8,32], index: 3, kind: output, shape index: {}]  }
   0x1   :  { %s9_s14 = sshll.u32 %s688_s0, 4  ;;  %s10_s14 = int_to_ptr.vmem [resolvable:$true] %s9_s14 }
   0x2   :  { %12 = dma.vmem_to_smem %s10_s14, 16, %s478_s15, [#allocation2] }
   0x3   :  { %448 = dma.done.wait [#allocation2], 16 }
   0x4   :  { %449 = vsyncadd [#allocation2], 4294967280 }
   0x5   :  { %15 = sfence }
   0x6   :  { %16 = vsyncpa [#allocation5], 0 }
   0x7   :  { %18 = vsyncpa [#allocation5 + $0x1], 0  ;;  %s502_s16 = smov 0   ;;  %s504_s17 = smov 0  }
   0x8   :  { %s506_s18 = smov 0   ;;  %s508_s19 = smov 0  }
   0x9   :  { %s510_s20 = smov 0   ;;  %s512_s21 = smov 0  }
   0xa LB: > { %s317_s0 = sadd.s32 4294967295, %s476_s21   ;;  %s318_s22 = sadd.s32 4294967294, %s476_s21   ;;  %s476_s21 = sphi %s512_s21, %s24_s21   ;;  %s472_s20 = sphi %s510_s20, %s703_s20   ;;  %s468_s19 = sphi %s508_s19, %s702_s19   ;;  %s464_s18 = sphi %s506_s18, %s701_s18   ;;  %s460_s17 = sphi %s504_s17, %s700_s17   ;;  %s456_s16 = sphi %s502_s16, %s699_s16  }
   0xb   : > { %s36_s23 = sadd.s32 1, %s472_s20  ;;  %s92_s24 = sadd.s32 1, %s464_s18 }
   0xc   : > { %p38_p0 = scmp.ge.s32.totalorder %s36_s23, 2  ;;  %p102_p1 = scmp.ne.s32.totalorder %s464_s18, %s460_s17 }
   0xd   : > { %p103_p2 = scmp.eq.s32.totalorder %s317_s0, 1  ;;  %p108_p3 = scmp.ne.s32.totalorder %s460_s17, %s456_s16 }
   0xe   : > { %s705_s23 = smov (%p38_p0, %s36_s23), 0  ;;  %p109_p5 = scmp.eq.s32.totalorder %s318_s22, 1 }
   0xf   : > { %694 = sst [smem:[#allocation8_spill]] %s705_s23  ;;  %p540_p4 = por %p103_p2, %p102_p1 }
  0x10   : > { %s87_s26 = ssub.s32 %s472_s20, %s705_s23  ;;  %p321_p6 = scmp.ge.s32.totalorder %s476_s21, 1 }
  0x11   : > { %p90_p7 = scmp.eq.s32.totalorder %s87_s26, 0  ;;  %p547_p8 = por %p109_p5, %p108_p3 }
  0x12   : > { %p137_p9 = scmp.lt.s32.totalorder %s476_s21, 3 }
  0x13   : > { %s553_s28 = scalar_select %p90_p7, %s464_s18, %s92_s24  }
  0x14   : > { %p138_p10 = pnand %p321_p6, %p137_p9 }
  0x15   : > { %s692_s29 = sand.u32 (!%p138_p10), 1, %s460_s17   ;;  %s556_s30 = sshll.u32 (!%p138_p10), %s468_s19, 3 }
  0x16   : > { %141 = sbr.rel (%p138_p10) target bundleno = 49 (0x31), region = 28  ;;  %s322_s4 = sshll.u32 (!%p138_p10), %s692_s29, 3 }
  0x17   : > { %s165_s5 = sld [smem:[#allocation3 + %s556_s30]] (!%p138_p10)  ;;  %s172_s6 = sadd.s32 (!%p138_p10), 1, %s556_s30 }
  0x18   : > { %s179_s7 = sadd.s32 (!%p138_p10), 2, %s556_s30  ;;  %s173_s8 = sld [smem:[#allocation3 + %s172_s6]] (!%p138_p10) }
  0x19   : > { %s186_s9 = sadd.s32 (!%p138_p10), 3, %s556_s30  ;;  %s180_s10 = sld [smem:[#allocation3 + %s179_s7]] (!%p138_p10) }
  0x1a   : > { %s193_s11 = sadd.s32 (!%p138_p10), 4, %s556_s30  ;;  %s187_s14 = sld [smem:[#allocation3 + %s186_s9]] (!%p138_p10) }
  0x1b   : > { %v168_v0 = vld [vmem:[%s690_s2] sm:$0x1]  ;;  %s200_s15 = sadd.s32 5, %s556_s30  ;;  %s572_s24 = sld [smem:[#allocation3 + %s193_s11]]  ;;  %vm170_vm0 = vcmask 253952  }
  0x1c   : > { %s574_s26 = sld [smem:[#allocation3 + %s200_s15]]  ;;  %s207_s6 = sadd.s32 6, %s556_s30  ;;  %v176_v3 = vld [vmem:[%s690_s2 + $0x1] sm:$0x1]  ;;  %v183_v4 = vld [vmem:[%s690_s2 + $0x2] sm:$0x1] }
  0x1d   : > { %s166_s22 = scalar_lea.vmem %s689_s1, %s165_s5  ;;  %s580_s12 = sld [smem:[#allocation3 + %s207_s6]]  ;;  %v190_v6 = vld [vmem:[%s690_s2 + $0x3] sm:$0x1]  ;;  %v197_v9 = vld [vmem:[%s690_s2 + $0x4] sm:$0x1] }
  0x1e   : > { %v167_v1 = vld [vmem:[%s166_s22] sm:$0x1]  ;;  %s214_s9 = sadd.s32 7, %s556_s30  ;;  %s174_s5 = scalar_lea.vmem %s689_s1, %s173_s8  ;;  %v204_v10 = vld [vmem:[%s690_s2 + $0x5] sm:$0x1] }
  0x1f   : > { %v169_v2 = vadd.f32 %v168_v0, %v167_v1  ;;  %s589_s15 = sld [smem:[#allocation3 + %s214_s9]]  ;;  %s591_s0 = scalar_lea.vmem [#allocation4], %s322_s4  ;;  %v175_v5 = vld [vmem:[%s174_s5] sm:$0x1]  ;;  %v211_v13 = vld [vmem:[%s690_s2 + $0x6] sm:$0x1] }
  0x20   : > { %s181_s6 = scalar_lea.vmem %s689_s1, %s180_s10  ;;  %v177_v7 = vadd.f32 %v176_v3, %v175_v5  ;;  %s188_s9 = scalar_lea.vmem %s689_s1, %s187_s14  ;;  %v218_v14 = vld [vmem:[%s690_s2 + $0x7] sm:$0x1] }
  0x21   : > { %171 = vst.msk [vmem:[%s591_s0] sm:$0x1] %vm170_vm0, %v169_v2  ;;  %v182_v8 = vld [vmem:[%s181_s6] sm:$0x1]  ;;  %s233_s22 = scalar_lea.hbm %s691_s3, %s556_s30  ;;  %s195_s14 = scalar_lea.vmem %s689_s1, %s572_s24 }
  0x22   : > { %v184_v11 = vadd.f32 %v183_v4, %v182_v8  ;;  %v189_v12 = vld [vmem:[%s188_s9] sm:$0x1]  ;;  %178 = vst.msk [vmem:[%s591_s0 + $0x1] sm:$0x1] %vm170_vm0, %v177_v7  ;;  %s202_s11 = scalar_lea.vmem %s689_s1, %s574_s26  ;;  %s235_s24 = sshll.u32 %s591_s0, 4  ;;  %s236_s24 = int_to_ptr.vmem [resolvable:$true] %s235_s24 }
  0x23   : > { %v191_v15 = vadd.f32 %v190_v6, %v189_v12  ;;  %v196_v16 = vld [vmem:[%s195_s14] sm:$0x1]  ;;  %s209_s10 = scalar_lea.vmem %s689_s1, %s580_s12  ;;  %s637_s29 = sshll.u32 %s233_s22, 4  ;;  %s238_s29 = int_to_ptr.hbm [resolvable:$true] %s637_s29 }
  0x24   : > { %185 = vst.msk [vmem:[%s591_s0 + $0x2] sm:$0x1] %vm170_vm0, %v184_v11  ;;  %v198_v17 = vadd.f32 %v197_v9, %v196_v16  ;;  %v203_v18 = vld [vmem:[%s202_s11] sm:$0x1]  ;;  %s697_s12 = sand.u32 1, %s460_s17   ;;  %s410_s14 = sshra.s32 %s238_s29, 4  ;;  %s411_s14 = int_to_ptr.hbm [resolvable:$true] %s410_s14 }
  0x25   : > { %192 = vst.msk [vmem:[%s591_s0 + $0x3] sm:$0x1] %vm170_vm0, %v191_v15  ;;  %v205_v19 = vadd.f32 %v204_v10, %v203_v18  ;;  %v210_v20 = vld [vmem:[%s209_s10] sm:$0x1]  ;;  %s216_s23 = scalar_lea.vmem %s689_s1, %s589_s15  ;;  %s222_s22 = scalar_lea.sflag [#allocation5], %s697_s12 }
  0x26   : > { %199 = vst.msk [vmem:[%s591_s0 + $0x4] sm:$0x1] %vm170_vm0, %v198_v17  ;;  %v212_v21 = vadd.f32 %v211_v13, %v210_v20  ;;  %v217_v22 = vld [vmem:[%s216_s23] sm:$0x1]  ;;  %s412_s8 = scalar_lea.hbm %s411_s14, 8  ;;  %s416_s7 = scalar_lea.hbm %s691_s3, 16 }
  0x27   : > { %206 = vst.msk [vmem:[%s591_s0 + $0x5] sm:$0x1] %vm170_vm0, %v205_v19  ;;  %v219_v23 = vadd.f32 %v218_v14, %v217_v22  ;;  %p413_p11 = scmp.ne.s32.totalorder %s411_s14, %s412_s8  ;;  %p417_p0 = scmp.lt.s32.totalorder %s411_s14, %s691_s3 }
  0x28   : > { %213 = vst.msk [vmem:[%s591_s0 + $0x6] sm:$0x1] %vm170_vm0, %v212_v21  ;;  %p418_p1 = scmp.lt.s32.totalorder %s416_s7, %s412_s8 }
  0x29   : > { %220 = vst.msk [vmem:[%s591_s0 + $0x7] sm:$0x1] %vm170_vm0, %v219_v23  ;;  %p414_p12 = pnand %p413_p11, %p540_p4 }
  0x2a   : > { %p419_p2 = por %p418_p1, %p417_p0 }
  0x2b   : > { %p415_p13 = pneg %p414_p12 }
  0x2d   : > { %p420_p3 = pnand %p419_p2, %p415_p13 }
  0x2f   : > { %423 = shalt.err (!%p420_p3)
}
  0x30   : > { %328 = dma.vmem_to_hbm [thread:$0]  (%p540_p4), %s236_s24, 128, %s238_s29, %s222_s22  }
  0x31 PF: > { %p334_p5 = scmp.ge.s32.totalorder %s476_s21, 2  ;;  %s249_s0 = sand.u32 1, %s456_s16  }
  0x32   : > { %s250_s9 = scalar_lea.sflag [#allocation5], %s249_s0 }
  0x33   : > { %p331_p6 = pnand %p334_p5, %p547_p8 }
  0x35   : > { %p332_p7 = pneg %p331_p6 }
  0x37   : > { %451 = dma.done.wait (%p332_p7), %s250_s9, 128  }
  0x38   : > { %453 = vsyncadd (%p332_p7), %s250_s9, 4294967168  ;;  %s24_s21 = sadd.s32 1, %s476_s21   ;;  %s698_s25 = sld [smem:[#allocation8_spill]] }
  0x39   : > { %p21_p9 = scmp.ge.s32.totalorder %s24_s21, 4   ;;  %s699_s16 = smov %s460_s17 }
  0x3a   : > { %s700_s17 = smov %s464_s18  ;;  %s701_s18 = smov %s553_s28 }
  0x3b   : > { %s702_s19 = smov %s472_s20  ;;  %23 = sbr.rel (!%p21_p9) target bundleno = 10 (0xa), region = 71 }
  0x3e   : > { %s703_s20 = smov %s698_s25 }
  0x40   :  { %256 = vsyncpa [#allocation5], 1 }
  0x41   :  { %258 = vsyncpa [#allocation5 + $0x1], 1 }

</bundles_post_ra>
